<compile_context>
chip_gen: v7x
topology: tpu7x:2x2x1
jax: 0.10.0
libtpu: 0.0.40
codegen_flags: <defaults>
</compile_context>

<pallas_src>
import functools

import jax
import jax.numpy as jnp
from jax.experimental import pallas as pl
from jax.experimental.pallas import tpu as pltpu


def _accuracy_kernel(logits_ref, labels_ref, out_ref):
    """One (C, TILE_L) lane-dense tile -> independent per-tile match count."""
    logits = logits_ref[...]                 # [C, TL], native dtype (no upcast)
    labels = labels_ref[...]                 # [1, TL] int32, -1 = padded/invalid
    c = logits.shape[0]

    # First-occurrence argmax over the class (sublane) axis, matching torch.
    col_max = jnp.max(logits, axis=0, keepdims=True)               # [1, TL]
    class_ids = jax.lax.broadcasted_iota(jnp.int32, (c, 1), 0)     # [C, 1]
    pred = jnp.min(jnp.where(logits == col_max, class_ids, jnp.int32(c)),
                   axis=0, keepdims=True)                          # [1, TL]

    # -1 label padding (ragged tail / OOB lanes) can never equal pred in [0, C].
    matches = (labels == pred).astype(jnp.int32)                   # [1, TL]
    count = jnp.sum(matches, axis=1, keepdims=True)                # [1, 1]

    # Lane-dense, unmasked store of the per-tile partial count.
    out_ref[...] = jnp.broadcast_to(count.reshape(1, 1, 1), out_ref.shape)


@functools.partial(jax.jit, static_argnames=("idx_start", "idx_end", "tile_l"))
def true_label_accuracy(full_logits, true_labels, *, idx_start, idx_end,
                        tile_l=None):
    """accuracy = mean(argmax(full_logits[idx_start:idx_end], -1) == labels)."""
    N, C = full_logits.shape
    L = idx_end - idx_start
    assert 0 <= idx_start <= idx_end <= N and true_labels.shape[0] == L

    itemsize = jnp.dtype(full_logits.dtype).itemsize
    if tile_l is None:
        # ~4 MiB of logits payload per buffer, lanes a multiple of 128.
        target_bytes = 4 * 1024 * 1024
        tile_l = (target_bytes // max(1, C * itemsize)) // 128 * 128
        tile_l = int(min(65536, max(128, tile_l)))
    if L <= tile_l:
        tile_l, num_tiles = L, 1                 # single full-extent block
    else:
        tile_l = max(128, (int(tile_l) // 128) * 128)
        num_tiles = pl.cdiv(L, tile_l)
    padded_l = num_tiles * tile_l

    # One fused slice+transpose copy -> lane-dense class-major [C, L] layout
    # (samples on lanes).  No explicit pad of the logits.
    logits_t = full_logits[idx_start:idx_end].T

    # Pad only the tiny label row with -1: masks the ragged last logits tile.
    labels2d = jnp.pad(true_labels.astype(jnp.int32)[None, :],
                       ((0, 0), (0, padded_l - L)), constant_values=-1)

    partials = pl.pallas_call(
        _accuracy_kernel,
        out_shape=jax.ShapeDtypeStruct((num_tiles, 1, 128), jnp.int32),
        grid=(num_tiles,),
        in_specs=[
            pl.BlockSpec((C, tile_l), lambda i: (0, i)),   # logits tile
            pl.BlockSpec((1, tile_l), lambda i: (0, i)),   # labels tile
        ],
        # Independent per-tile partial counts -> safe under "parallel".
        out_specs=pl.BlockSpec((1, 1, 128), lambda i: (i, 0, 0)),
        compiler_params=pltpu.CompilerParams(
            dimension_semantics=("parallel",),
            vmem_limit_bytes=48 * 1024 * 1024,
        ),
    )(logits_t, labels2d)

    total = partials[:, 0, 0].sum().astype(jnp.float32)
    return total / jnp.float32(L)


class TrueLabelSimilarity:
    """JAX/Pallas port of the PyTorch `true_label_similarity` module."""

    def __init__(self, id, labels, num_clients, device=None):
        self.id = id
        self.labels = labels
        self.lengs = [len(labels[i]) for i in range(num_clients)]

    def __call__(self, input, target=None):
        # Static (Python-int) slice bounds, exactly like the torch module.
        idx_start = int(sum(self.lengs[:self.id]))
        idx_end = int(sum(self.lengs[:self.id + 1]))
        true_lbs = jnp.asarray(self.labels[self.id], dtype=jnp.int32)
        return true_label_accuracy(input, true_lbs,
                                   idx_start=idx_start, idx_end=idx_end)


if __name__ == "__main__":
    key = jax.random.PRNGKey(0)
    k_logits, k_lbl0, k_lbl1, k_big, k_biglbl = jax.random.split(key, 5)

    # --- small federated-client check (mirrors the torch module usage) ------
    num_clients = 2
    num_classes = 10
    per_client = 8
    total = num_clients * per_client

    labels = [
        [int(v) for v in jax.random.randint(k_lbl0, (per_client,), 0, num_classes)],
        [int(v) for v in jax.random.randint(k_lbl1, (per_client,), 0, num_classes)],
    ]
    logits = jax.random.normal(k_logits, (total, num_classes), dtype=jnp.float32)
    target = jnp.zeros((total,), dtype=jnp.int32)   # unused, as in torch forward

    pred_full = jnp.argmax(logits, axis=1).astype(jnp.int32)
    for client_id in range(num_clients):
        module = TrueLabelSimilarity(id=client_id, labels=labels,
                                     num_clients=num_clients)
        acc = jax.block_until_ready(module(logits, target))
        s, e = per_client * client_id, per_client * (client_id + 1)
        ref = (jnp.asarray(labels[client_id], jnp.int32) == pred_full[s:e]
               ).sum().astype(jnp.float32) / per_client
        assert jnp.allclose(acc, ref), (client_id, acc, ref)

    # --- multi-tile + ragged-tail path (forced small tile) ------------------
    L_big = 300
    big_logits = jax.random.normal(k_big, (L_big, num_classes), dtype=jnp.float32)
    big_labels = jax.random.randint(k_biglbl, (L_big,), 0, num_classes)
    acc = jax.block_until_ready(
        true_label_accuracy(big_logits, big_labels.astype(jnp.int32),
                            idx_start=0, idx_end=L_big, tile_l=128))
    ref = (jnp.argmax(big_logits, axis=1) == big_labels).mean().astype(jnp.float32)
    assert jnp.allclose(acc, ref), (acc, ref)

    # --- native bf16 path (no f32 upcast inside the kernel) -----------------
    bf_logits = big_logits.astype(jnp.bfloat16)
    acc = jax.block_until_ready(
        true_label_accuracy(bf_logits, big_labels.astype(jnp.int32),
                            idx_start=0, idx_end=L_big))
    ref = (jnp.argmax(bf_logits, axis=1) == big_labels).mean().astype(jnp.float32)
    assert jnp.allclose(acc, ref), (acc, ref)

    print("KERNEL_OK")
</pallas_src>

<mosaic_0001>
module attributes {stable_mosaic.version = 11 : i64} {
  func.func @_accuracy_kernel(%arg0: i32, %arg1: memref<10x8xf32, #tpu.memory_space<vmem>>, %arg2: memref<1x8xi32, #tpu.memory_space<vmem>>, %arg3: memref<1x1x128xi32, #tpu.memory_space<vmem>>) attributes {dimension_semantics = [#tpu.dimension_semantics<parallel>], iteration_bounds = array<i64: 1>, scalar_prefetch = 0 : i64, scratch_operands = 0 : i64, tpu.core_type = #tpu.core_type<tc>, window_params = [{transform_indices = @transform_0, window_bounds = array<i64: 10, 8>}, {transform_indices = @transform_1, window_bounds = array<i64: 1, 8>}, {transform_indices = @transform_2, window_bounds = array<i64: 1, 1, 128>}]} {
    %c0 = arith.constant 0 : index
    %c0_0 = arith.constant 0 : index
    %0 = vector.load %arg1[%c0, %c0_0] : memref<10x8xf32, #tpu.memory_space<vmem>>, vector<10x8xf32>
    %c0_1 = arith.constant 0 : index
    %c0_2 = arith.constant 0 : index
    %1 = vector.load %arg2[%c0_1, %c0_2] : memref<1x8xi32, #tpu.memory_space<vmem>>, vector<1x8xi32>
    %cst = arith.constant dense<0xFF800000> : vector<8xf32>
    %2 = vector.multi_reduction <maximumf>, %0, %cst [0] : vector<10x8xf32> to vector<8xf32>
    %3 = vector.shape_cast %2 : vector<8xf32> to vector<1x8xf32>
    %4 = tpu.iota {dimensions = array<i32: 0>} : vector<10x1xi32>
    %5 = vector.broadcast %3 : vector<1x8xf32> to vector<10x8xf32>
    %6 = arith.cmpf oeq, %0, %5 : vector<10x8xf32>
    %c10_i32 = arith.constant 10 : i32
    %7 = vector.shape_cast %4 : vector<10x1xi32> to vector<10x1xi32>
    %8 = vector.broadcast %7 : vector<10x1xi32> to vector<10x8xi32>
    %9 = vector.broadcast %c10_i32 : i32 to vector<10x8xi32>
    %10 = arith.select %6, %8, %9 : vector<10x8xi1>, vector<10x8xi32>
    %cst_3 = arith.constant dense<2147483647> : vector<8xi32>
    %11 = vector.multi_reduction <minsi>, %10, %cst_3 [0] : vector<10x8xi32> to vector<8xi32>
    %12 = vector.shape_cast %11 : vector<8xi32> to vector<1x8xi32>
    %13 = arith.cmpi eq, %1, %12 : vector<1x8xi32>
    %14 = arith.extui %13 : vector<1x8xi1> to vector<1x8xi32>
    %cst_4 = arith.constant dense<0> : vector<1xi32>
    %15 = vector.multi_reduction <add>, %14, %cst_4 [1] : vector<1x8xi32> to vector<1xi32>
    %16 = vector.shape_cast %15 : vector<1xi32> to vector<1x1xi32>
    %17 = vector.shape_cast %16 : vector<1x1xi32> to vector<1x1x1xi32>
    %18 = vector.shape_cast %17 : vector<1x1x1xi32> to vector<1x1x1xi32>
    %19 = vector.broadcast %18 : vector<1x1x1xi32> to vector<1x1x128xi32>
    %c0_5 = arith.constant 0 : index
    %c0_6 = arith.constant 0 : index
    %c0_7 = arith.constant 0 : index
    %20 = vector.load %arg3[%c0_5, %c0_6, %c0_7] : memref<1x1x128xi32, #tpu.memory_space<vmem>>, vector<1x1x128xi32>
    tpu.vector_store %arg3[%c0_5, %c0_6, %c0_7], %19 {strides = array<i32>} : memref<1x1x128xi32, #tpu.memory_space<vmem>>, vector<1x1x128xi32>,
    return
  }
  func.func @transform_0(%arg0: i32) -> (i32, i32) {
    %c0_i32 = arith.constant 0 : i32
    %c0_i32_0 = arith.constant 0 : i32
    return %c0_i32, %arg0 : i32, i32
  }
  func.func @transform_1(%arg0: i32) -> (i32, i32) {
    %c0_i32 = arith.constant 0 : i32
    %c0_i32_0 = arith.constant 0 : i32
    return %c0_i32, %arg0 : i32, i32
  }
  func.func @transform_2(%arg0: i32) -> (i32, i32, i32) {
    %c0_i32 = arith.constant 0 : i32
    %c0_i32_0 = arith.constant 0 : i32
    %c0_i32_1 = arith.constant 0 : i32
    return %arg0, %c0_i32, %c0_i32_0 : i32, i32, i32
  }
}

</mosaic_0001>

<bundles_post_ra>
// kernel: true_label_accuracy.1
= control target key start
LH: loop header
LB: loop body
LE: loop exit
PB: predicated region body
PF: predicated region fallthrough
CT: control target
= control target key end

     0   :  { %vm14_vm0 = vcmask 64512   ;;  %vm16_vm1 = vcmask 58368   ;;  %v25_v6 = vlaneseq  ;;  %vm47_vm8 = vcmask 57344   ;;  %s99_s0 = inlined_call_operand.vmem [shape: f32[10,8], index: 0, kind: input, shape index: {}]   ;;  %s100_s1 = inlined_call_operand.vmem [shape: s32[1,8], index: 1, kind: input, shape index: {}]   ;;  %s101_s2 = inlined_call_operand.vmem [shape: s32[1,1,128], index: 2, kind: output, shape index: {}]  }
   0x1   :  { %v11_v0 = vld [vmem:[%s99_s0] sm:$0xff]  ;;  %v12_v1 = vld [vmem:[%s99_s0 + $0x8] sm:$0x3]  ;;  %v67_v26 = vmov 0  }
   0x2   :  { %v15_v2 = vsel %vm14_vm0, %v11_v0, -inf  ;;  %v17_v3 = vsel %vm16_vm1, %v12_v1, -inf  ;;  %v26_v9 = vshrl.u32 %v25_v6, 7  ;;  %v13_v24 = vld [vmem:[%s100_s1] sm:$0x1] }
   0x3   :  { %v18_v4 = vmax.f32 %v15_v2, %v17_v3 }
   0x4   :  { %v27_v12 = vadd.s32 8, %v26_v9 }
   0x5   :  { %v19_v5 = vrot.slane %v18_v4, 4 }
   0x7   :  { %v20_v7 = vmax.f32 %v18_v4, %v19_v5 }
   0x9   :  { %v21_v8 = vrot.slane %v20_v7, 2 }
   0xb   :  { %v22_v10 = vmax.f32 %v20_v7, %v21_v8 }
   0xd   :  { %v23_v11 = vrot.slane %v22_v10, 1 }
   0xf   :  { %v24_v13 = vmax.f32 %v22_v10, %v23_v11 }
  0x11   :  { %vm28_vm2 = vcmp.eq.f32.partialorder %v11_v0, %v24_v13  ;;  %vm29_vm3 = vcmp.eq.f32.partialorder %v12_v1, %v24_v13 }
  0x12   :  { %v30_v14 = vsel %vm28_vm2, %v26_v9, 10  ;;  %v31_v15 = vsel %vm29_vm3, %v27_v12, 10 }
  0x13   :  { %v32_v16 = vsel %vm14_vm0, %v30_v14, 2147483647  ;;  %v33_v17 = vsel %vm16_vm1, %v31_v15, 2147483647 }
  0x14   :  { %vm34_vm4 = vcmp.lt.s32.totalorder %v32_v16, %v33_v17 }
  0x15   :  { %v35_v18 = vsel %vm34_vm4, %v32_v16, %v33_v17 }
  0x16   :  { %v36_v19 = vrot.slane %v35_v18, 4 }
  0x18   :  { %vm37_vm5 = vcmp.lt.s32.totalorder %v35_v18, %v36_v19 }
  0x19   :  { %v38_v20 = vsel %vm37_vm5, %v35_v18, %v36_v19 }
  0x1a   :  { %v39_v21 = vrot.slane %v38_v20, 2 }
  0x1c   :  { %vm40_vm6 = vcmp.lt.s32.totalorder %v38_v20, %v39_v21 }
  0x1d   :  { %v41_v22 = vsel %vm40_vm6, %v38_v20, %v39_v21 }
  0x1e   :  { %v42_v23 = vrot.slane %v41_v22, 1 }
  0x20   :  { %vm43_vm7 = vcmp.lt.s32.totalorder %v41_v22, %v42_v23 }
  0x21   :  { %v44_v25 = vsel %vm43_vm7, %v41_v22, %v42_v23 }
  0x22   :  { %vm45_vm9 = vcmp.eq.s32.totalorder %v13_v24, %v44_v25 }
  0x23   :  { %v46_v27 = vsel %vm45_vm9, 1, %v67_v26 }
  0x24   :  { %v48_v28 = vsel %vm47_vm8, %v46_v27, 0 }
  0x25   :  { %v50_v29 = vshrl.u32 %v48_v28, 16  ;;  %v49_v30 = vand.u32 65535, %v48_v28 }
  0x27   :  { %v52_v31 = vcvt.s32.f32 %v50_v29  ;;  %v51_v32 = vcvt.s32.f32 %v49_v30 }
  0x29   :  { %55 = vadd.xlane.f32.xlu0 %v52_v31 }
  0x2d   :  { %53 = vadd.xlane.f32.xlu0 %v51_v32 }
  0xb6   :  { %v56_v33 = vpop.xlane.xlu0 %55 }
  0xb7   :  { %v58_v34 = vcvt.f32.s32 %v56_v33 }
  0xb9   :  { %v59_v36 = vshll.u32 %v58_v34, 16 }
  0xba   :  { %v54_v35 = vpop.xlane.xlu0 %53 }
  0xbb   :  { %v57_v37 = vcvt.f32.s32 %v54_v35 }
  0xbd   :  { %v60_v38 = vadd.s32 %v59_v36, %v57_v37 }
  0xbf   :  { %61 = vst [vmem:[%s101_s2] sm:$0x1] %v60_v38 }

</bundles_post_ra>
